<compile_context>
chip_gen: v7x
topology: tpu7x:2x2x1
jax: 0.10.0
libtpu: 0.0.40
codegen_flags: <defaults>
</compile_context>

<pallas_src>
import functools

import jax
import jax.numpy as jnp
from jax.experimental import pallas as pl
from jax.experimental.pallas import tpu as pltpu

# Module has no learned parameters; only the scalar `strength` from __init__.
STRENGTH = 0.8
THRESHOLD = 0.05
KSIZE = 5          # vertical smoothing kernel: ones(5, 1) / 5
HALF = KSIZE // 2  # replicate padding = 2


def _make_kernel(H, W, G, strength):
    """Kernel for blocks of shape (P, H, G*W); G original planes packed along lanes."""
    GW = G * W
    # torch.std (unbiased) divides by W-1; W == 1 gives NaN in torch too.
    inv_wm1 = (1.0 / (W - 1)) if W > 1 else float("nan")

    def vert_smooth(a):
        # 5-tap mean over H with replicate padding, built from sublane rolls
        # (XLU slot, otherwise idle) + edge-row fixups instead of the old
        # concatenate + overlapping-slice copies.
        h_idx = jax.lax.broadcasted_iota(jnp.int32, a.shape, 1)
        top = a[:, 0:1, :]
        bot = a[:, H - 1:H, :]
        acc = a
        for k in range(-HALF, HALF + 1):
            if k == 0:
                continue
            # r[:, h, :] = a[:, (h + k) % H, :]
            r = pltpu.roll(a, shift=(-k) % H, axis=1)
            if k < 0:
                r = jnp.where(h_idx < -k, top, r)          # replicate first row
            else:
                r = jnp.where(h_idx >= H - k, bot, r)      # replicate last row
            acc = acc + r
        return acc * (1.0 / KSIZE)

    def seg_sum(a, lane_mod):
        # Sum over each aligned length-W lane segment; result is broadcast to
        # every lane of its segment.  Exact f32: log2(W) doubling steps of
        # circular-within-segment lane rolls + selects (no MXU, no reshapes).
        if G == 1:
            return jnp.sum(a, axis=2, keepdims=True)
        s = a
        d = 1
        while d < W:
            r_in = pltpu.roll(s, shift=(GW - d) % GW, axis=2)   # s[:, :, l + d]
            r_wrap = pltpu.roll(s, shift=W - d, axis=2)          # s[:, :, l + d - W]
            s = s + jnp.where(lane_mod < W - d, r_in, r_wrap)
            d *= 2
        return s

    def kernel(x_ref, o_ref):
        x = x_ref[...].astype(jnp.float32)                       # (P, H, GW)
        lane_mod = None
        if G > 1:
            lane = jax.lax.broadcasted_iota(jnp.int32, x.shape, 2)
            lane_mod = lane % W

        # Vertical smoothing of every column (per original plane).
        vsm = vert_smooth(x)

        # Per-row unbiased std over W (one pass: sum and sum of squares).
        s1 = seg_sum(x, lane_mod)
        s2 = seg_sum(x * x, lane_mod)
        var = (s2 - s1 * s1 * (1.0 / W)) * inv_wm1
        row_std = jnp.sqrt(jnp.maximum(var, 0.0))

        # Soft "flat row" mask, smoothed vertically, then blend.
        line_mask = jax.nn.sigmoid((THRESHOLD - row_std) * 10.0)
        line_mask = vert_smooth(line_mask)
        ms = line_mask * strength
        o_ref[...] = (x * (1.0 - ms) + vsm * ms).astype(o_ref.dtype)

    return kernel


def _choose_plane_tile(n_planes, plane_bytes, target_bytes=2 << 20, min_steps=4):
    """Largest divisor of n_planes whose block fits target_bytes, preferring to
    leave >= min_steps grid steps for pipelining / megacore sharding (v7x)."""
    divs = [d for d in range(1, n_planes + 1) if n_planes % d == 0]
    fit = [d for d in divs if d * plane_bytes <= target_bytes] or [1]
    good = [d for d in fit if n_planes // d >= min_steps]
    return max(good) if good else max(fit)


@functools.partial(jax.jit, static_argnames=("strength",))
def direct_horizontal_line_filter(x, strength=STRENGTH):
    """x: [B, C, H, W] -> [B, C, H, W]; mirrors DirectHorizontalLineFilter.forward."""
    B, C, H, W = x.shape
    N = B * C
    x2 = x.reshape(N, H, W)

    # Lane packing: fold G planes into the lane axis so the last dim is a dense
    # 128 lanes (e.g. W=16 -> G=8, G*W=128).  Skipped when it does not apply.
    G = 1
    if W < 128 and 128 % W == 0:
        g = 128 // W
        if N % g == 0 and H % 8 == 0:
            G = g
    NP = N // G
    GW = G * W
    if G > 1:
        x2 = x2.reshape(NP, G, H, W).transpose(0, 2, 1, 3).reshape(NP, H, GW)

    # Planes per block: biggest divisor of NP keeping the input block ~<= 2 MiB
    # (safe for v7x's 64 MiB VMEM with double-buffered in/out + intermediates).
    plane_bytes = H * GW * x2.dtype.itemsize
    P = _choose_plane_tile(NP, plane_bytes)
    grid = (NP // P,)

    out = pl.pallas_call(
        _make_kernel(H, W, G, strength),
        out_shape=jax.ShapeDtypeStruct((NP, H, GW), x.dtype),
        grid=grid,
        in_specs=[pl.BlockSpec((P, H, GW), lambda i: (i, 0, 0))],
        out_specs=pl.BlockSpec((P, H, GW), lambda i: (i, 0, 0)),
        compiler_params=pltpu.CompilerParams(
            dimension_semantics=("parallel",),
            vmem_limit_bytes=32 * 1024 * 1024,
        ),
    )(x2)

    if G > 1:
        out = out.reshape(NP, H, G, W).transpose(0, 2, 1, 3).reshape(N, H, W)
    return out.reshape(B, C, H, W)


def _reference(x):
    """Pure-JAX reference replicating the PyTorch forward for validation."""
    B, C, H, W = x.shape

    def smooth_rows(a):  # a: (..., H, last)
        padded = jnp.concatenate(
            [a[..., 0:1, :], a[..., 0:1, :], a, a[..., H - 1:H, :], a[..., H - 1:H, :]],
            axis=-2,
        )
        return sum(padded[..., k:k + H, :] for k in range(KSIZE)) / KSIZE

    vsm = smooth_rows(x)
    mean = jnp.mean(x, axis=3, keepdims=True)
    std = jnp.sqrt(jnp.sum((x - mean) ** 2, axis=3, keepdims=True) / (W - 1))
    mask = jax.nn.sigmoid((THRESHOLD - std) * 10.0)
    mask = smooth_rows(mask)
    ms = mask * STRENGTH
    return x * (1.0 - ms) + vsm * ms


if __name__ == "__main__":
    key = jax.random.PRNGKey(0)
    x = jax.random.normal(key, (2, 4, 16, 16), dtype=jnp.float32)

    out = direct_horizontal_line_filter(x)
    out = jax.block_until_ready(out)

    ref = _reference(x)
    assert out.shape == (2, 4, 16, 16)
    assert jnp.allclose(out, ref, atol=1e-4, rtol=1e-4), "mismatch vs reference"

    print("KERNEL_OK")
</pallas_src>

<mosaic_0001>
module attributes {stable_mosaic.version = 11 : i64} {
  func.func @kernel(%arg0: i32, %arg1: memref<1x16x128xf32, #tpu.memory_space<vmem>>, %arg2: memref<1x16x128xf32, #tpu.memory_space<vmem>>) attributes {dimension_semantics = [#tpu.dimension_semantics<parallel>], iteration_bounds = array<i64: 1>, scalar_prefetch = 0 : i64, scratch_operands = 0 : i64, tpu.core_type = #tpu.core_type<tc>, window_params = [{transform_indices = @transform_0, window_bounds = array<i64: 1, 16, 128>}, {transform_indices = @transform_1, window_bounds = array<i64: 1, 16, 128>}]} {
    %c0 = arith.constant 0 : index
    %c0_0 = arith.constant 0 : index
    %c0_1 = arith.constant 0 : index
    %0 = vector.load %arg1[%c0, %c0_0, %c0_1] : memref<1x16x128xf32, #tpu.memory_space<vmem>>, vector<1x16x128xf32>
    %1 = tpu.iota {dimensions = array<i32: 2>} : vector<1x16x128xi32>
    %c16_i32 = arith.constant 16 : i32
    %c0_i32 = arith.constant 0 : i32
    %2 = arith.cmpi eq, %c16_i32, %c0_i32 : i32
    %c1_i32 = arith.constant 1 : i32
    %3 = arith.select %2, %c1_i32, %c16_i32 : i32
    %4 = vector.broadcast %3 : i32 to vector<1x16x128xi32>
    %5 = arith.remsi %1, %4 : vector<1x16x128xi32>
    %c0_i32_2 = arith.constant 0 : i32
    %6 = vector.broadcast %c0_i32_2 : i32 to vector<1x16x128xi32>
    %7 = arith.cmpi ne, %5, %6 : vector<1x16x128xi32>
    %c0_i32_3 = arith.constant 0 : i32
    %8 = vector.broadcast %c0_i32_3 : i32 to vector<1x16x128xi32>
    %9 = arith.cmpi slt, %5, %8 : vector<1x16x128xi32>
    %c0_i32_4 = arith.constant 0 : i32
    %10 = arith.cmpi slt, %3, %c0_i32_4 : i32
    %11 = vector.broadcast %10 : i1 to vector<1x16x128xi1>
    %12 = vector.broadcast %11 : vector<1x16x128xi1> to vector<1x16x128xi1>
    %13 = arith.xori %9, %12 : vector<1x16x128xi1>
    %14 = arith.andi %13, %7 : vector<1x16x128xi1>
    %15 = vector.broadcast %3 : i32 to vector<1x16x128xi32>
    %16 = arith.addi %5, %15 : vector<1x16x128xi32>
    %17 = arith.select %14, %16, %5 : vector<1x16x128xi1>, vector<1x16x128xi32>
    %18 = tpu.iota {dimensions = array<i32: 1>} : vector<1x16x128xi32>
    %19 = vector.extract_strided_slice %0 {offsets = [0, 0, 0], sizes = [1, 1, 128], strides = [1, 1, 1]} : vector<1x16x128xf32> to vector<1x1x128xf32>
    %20 = vector.extract_strided_slice %0 {offsets = [0, 15, 0], sizes = [1, 1, 128], strides = [1, 1, 1]} : vector<1x16x128xf32> to vector<1x1x128xf32>
    %c2_i32 = arith.constant 2 : i32
    %21 = tpu.dynamic_rotate %0 by %c2_i32 dim 1 : vector<1x16x128xf32>, i32 -> vector<1x16x128xf32>
    %c2_i32_5 = arith.constant 2 : i32
    %22 = vector.broadcast %c2_i32_5 : i32 to vector<1x16x128xi32>
    %23 = arith.cmpi slt, %18, %22 : vector<1x16x128xi32>
    %24 = vector.shape_cast %19 : vector<1x1x128xf32> to vector<1x1x128xf32>
    %25 = vector.broadcast %24 : vector<1x1x128xf32> to vector<1x16x128xf32>
    %26 = arith.select %23, %25, %21 : vector<1x16x128xi1>, vector<1x16x128xf32>
    %27 = arith.addf %0, %26 : vector<1x16x128xf32>
    %c1_i32_6 = arith.constant 1 : i32
    %28 = tpu.dynamic_rotate %0 by %c1_i32_6 dim 1 : vector<1x16x128xf32>, i32 -> vector<1x16x128xf32>
    %c1_i32_7 = arith.constant 1 : i32
    %29 = vector.broadcast %c1_i32_7 : i32 to vector<1x16x128xi32>
    %30 = arith.cmpi slt, %18, %29 : vector<1x16x128xi32>
    %31 = vector.shape_cast %19 : vector<1x1x128xf32> to vector<1x1x128xf32>
    %32 = vector.broadcast %31 : vector<1x1x128xf32> to vector<1x16x128xf32>
    %33 = arith.select %30, %32, %28 : vector<1x16x128xi1>, vector<1x16x128xf32>
    %34 = arith.addf %27, %33 : vector<1x16x128xf32>
    %c15_i32 = arith.constant 15 : i32
    %35 = tpu.dynamic_rotate %0 by %c15_i32 dim 1 : vector<1x16x128xf32>, i32 -> vector<1x16x128xf32>
    %c15_i32_8 = arith.constant 15 : i32
    %36 = vector.broadcast %c15_i32_8 : i32 to vector<1x16x128xi32>
    %37 = arith.cmpi sge, %18, %36 : vector<1x16x128xi32>
    %38 = vector.shape_cast %20 : vector<1x1x128xf32> to vector<1x1x128xf32>
    %39 = vector.broadcast %38 : vector<1x1x128xf32> to vector<1x16x128xf32>
    %40 = arith.select %37, %39, %35 : vector<1x16x128xi1>, vector<1x16x128xf32>
    %41 = arith.addf %34, %40 : vector<1x16x128xf32>
    %c14_i32 = arith.constant 14 : i32
    %42 = tpu.dynamic_rotate %0 by %c14_i32 dim 1 : vector<1x16x128xf32>, i32 -> vector<1x16x128xf32>
    %c14_i32_9 = arith.constant 14 : i32
    %43 = vector.broadcast %c14_i32_9 : i32 to vector<1x16x128xi32>
    %44 = arith.cmpi sge, %18, %43 : vector<1x16x128xi32>
    %45 = vector.shape_cast %20 : vector<1x1x128xf32> to vector<1x1x128xf32>
    %46 = vector.broadcast %45 : vector<1x1x128xf32> to vector<1x16x128xf32>
    %47 = arith.select %44, %46, %42 : vector<1x16x128xi1>, vector<1x16x128xf32>
    %48 = arith.addf %41, %47 : vector<1x16x128xf32>
    %cst = arith.constant 2.000000e-01 : f32
    %49 = vector.broadcast %cst : f32 to vector<1x16x128xf32>
    %50 = arith.mulf %48, %49 : vector<1x16x128xf32>
    %c127_i32 = arith.constant 127 : i32
    %51 = tpu.dynamic_rotate %0 by %c127_i32 dim 2 : vector<1x16x128xf32>, i32 -> vector<1x16x128xf32>
    %c15_i32_10 = arith.constant 15 : i32
    %52 = tpu.dynamic_rotate %0 by %c15_i32_10 dim 2 : vector<1x16x128xf32>, i32 -> vector<1x16x128xf32>
    %c15_i32_11 = arith.constant 15 : i32
    %53 = vector.broadcast %c15_i32_11 : i32 to vector<1x16x128xi32>
    %54 = arith.cmpi slt, %17, %53 : vector<1x16x128xi32>
    %55 = arith.select %54, %51, %52 : vector<1x16x128xi1>, vector<1x16x128xf32>
    %56 = arith.addf %0, %55 : vector<1x16x128xf32>
    %c126_i32 = arith.constant 126 : i32
    %57 = tpu.dynamic_rotate %56 by %c126_i32 dim 2 : vector<1x16x128xf32>, i32 -> vector<1x16x128xf32>
    %c14_i32_12 = arith.constant 14 : i32
    %58 = tpu.dynamic_rotate %56 by %c14_i32_12 dim 2 : vector<1x16x128xf32>, i32 -> vector<1x16x128xf32>
    %c14_i32_13 = arith.constant 14 : i32
    %59 = vector.broadcast %c14_i32_13 : i32 to vector<1x16x128xi32>
    %60 = arith.cmpi slt, %17, %59 : vector<1x16x128xi32>
    %61 = arith.select %60, %57, %58 : vector<1x16x128xi1>, vector<1x16x128xf32>
    %62 = arith.addf %56, %61 : vector<1x16x128xf32>
    %c124_i32 = arith.constant 124 : i32
    %63 = tpu.dynamic_rotate %62 by %c124_i32 dim 2 : vector<1x16x128xf32>, i32 -> vector<1x16x128xf32>
    %c12_i32 = arith.constant 12 : i32
    %64 = tpu.dynamic_rotate %62 by %c12_i32 dim 2 : vector<1x16x128xf32>, i32 -> vector<1x16x128xf32>
    %c12_i32_14 = arith.constant 12 : i32
    %65 = vector.broadcast %c12_i32_14 : i32 to vector<1x16x128xi32>
    %66 = arith.cmpi slt, %17, %65 : vector<1x16x128xi32>
    %67 = arith.select %66, %63, %64 : vector<1x16x128xi1>, vector<1x16x128xf32>
    %68 = arith.addf %62, %67 : vector<1x16x128xf32>
    %c120_i32 = arith.constant 120 : i32
    %69 = tpu.dynamic_rotate %68 by %c120_i32 dim 2 : vector<1x16x128xf32>, i32 -> vector<1x16x128xf32>
    %c8_i32 = arith.constant 8 : i32
    %70 = tpu.dynamic_rotate %68 by %c8_i32 dim 2 : vector<1x16x128xf32>, i32 -> vector<1x16x128xf32>
    %c8_i32_15 = arith.constant 8 : i32
    %71 = vector.broadcast %c8_i32_15 : i32 to vector<1x16x128xi32>
    %72 = arith.cmpi slt, %17, %71 : vector<1x16x128xi32>
    %73 = arith.select %72, %69, %70 : vector<1x16x128xi1>, vector<1x16x128xf32>
    %74 = arith.addf %68, %73 : vector<1x16x128xf32>
    %75 = arith.mulf %0, %0 : vector<1x16x128xf32>
    %c127_i32_16 = arith.constant 127 : i32
    %76 = tpu.dynamic_rotate %75 by %c127_i32_16 dim 2 : vector<1x16x128xf32>, i32 -> vector<1x16x128xf32>
    %c15_i32_17 = arith.constant 15 : i32
    %77 = tpu.dynamic_rotate %75 by %c15_i32_17 dim 2 : vector<1x16x128xf32>, i32 -> vector<1x16x128xf32>
    %c15_i32_18 = arith.constant 15 : i32
    %78 = vector.broadcast %c15_i32_18 : i32 to vector<1x16x128xi32>
    %79 = arith.cmpi slt, %17, %78 : vector<1x16x128xi32>
    %80 = arith.select %79, %76, %77 : vector<1x16x128xi1>, vector<1x16x128xf32>
    %81 = arith.addf %75, %80 : vector<1x16x128xf32>
    %c126_i32_19 = arith.constant 126 : i32
    %82 = tpu.dynamic_rotate %81 by %c126_i32_19 dim 2 : vector<1x16x128xf32>, i32 -> vector<1x16x128xf32>
    %c14_i32_20 = arith.constant 14 : i32
    %83 = tpu.dynamic_rotate %81 by %c14_i32_20 dim 2 : vector<1x16x128xf32>, i32 -> vector<1x16x128xf32>
    %c14_i32_21 = arith.constant 14 : i32
    %84 = vector.broadcast %c14_i32_21 : i32 to vector<1x16x128xi32>
    %85 = arith.cmpi slt, %17, %84 : vector<1x16x128xi32>
    %86 = arith.select %85, %82, %83 : vector<1x16x128xi1>, vector<1x16x128xf32>
    %87 = arith.addf %81, %86 : vector<1x16x128xf32>
    %c124_i32_22 = arith.constant 124 : i32
    %88 = tpu.dynamic_rotate %87 by %c124_i32_22 dim 2 : vector<1x16x128xf32>, i32 -> vector<1x16x128xf32>
    %c12_i32_23 = arith.constant 12 : i32
    %89 = tpu.dynamic_rotate %87 by %c12_i32_23 dim 2 : vector<1x16x128xf32>, i32 -> vector<1x16x128xf32>
    %c12_i32_24 = arith.constant 12 : i32
    %90 = vector.broadcast %c12_i32_24 : i32 to vector<1x16x128xi32>
    %91 = arith.cmpi slt, %17, %90 : vector<1x16x128xi32>
    %92 = arith.select %91, %88, %89 : vector<1x16x128xi1>, vector<1x16x128xf32>
    %93 = arith.addf %87, %92 : vector<1x16x128xf32>
    %c120_i32_25 = arith.constant 120 : i32
    %94 = tpu.dynamic_rotate %93 by %c120_i32_25 dim 2 : vector<1x16x128xf32>, i32 -> vector<1x16x128xf32>
    %c8_i32_26 = arith.constant 8 : i32
    %95 = tpu.dynamic_rotate %93 by %c8_i32_26 dim 2 : vector<1x16x128xf32>, i32 -> vector<1x16x128xf32>
    %c8_i32_27 = arith.constant 8 : i32
    %96 = vector.broadcast %c8_i32_27 : i32 to vector<1x16x128xi32>
    %97 = arith.cmpi slt, %17, %96 : vector<1x16x128xi32>
    %98 = arith.select %97, %94, %95 : vector<1x16x128xi1>, vector<1x16x128xf32>
    %99 = arith.addf %93, %98 : vector<1x16x128xf32>
    %100 = arith.mulf %74, %74 : vector<1x16x128xf32>
    %cst_28 = arith.constant 6.250000e-02 : f32
    %101 = vector.broadcast %cst_28 : f32 to vector<1x16x128xf32>
    %102 = arith.mulf %100, %101 : vector<1x16x128xf32>
    %103 = arith.subf %99, %102 : vector<1x16x128xf32>
    %cst_29 = arith.constant 0.0666666701 : f32
    %104 = vector.broadcast %cst_29 : f32 to vector<1x16x128xf32>
    %105 = arith.mulf %103, %104 : vector<1x16x128xf32>
    %cst_30 = arith.constant 0.000000e+00 : f32
    %106 = vector.broadcast %cst_30 : f32 to vector<1x16x128xf32>
    %107 = arith.maximumf %105, %106 : vector<1x16x128xf32>
    %108 = math.sqrt %107 : vector<1x16x128xf32>
    %cst_31 = arith.constant 5.000000e-02 : f32
    %109 = vector.broadcast %cst_31 : f32 to vector<1x16x128xf32>
    %110 = arith.subf %109, %108 : vector<1x16x128xf32>
    %cst_32 = arith.constant 1.000000e+01 : f32
    %111 = vector.broadcast %cst_32 : f32 to vector<1x16x128xf32>
    %112 = arith.mulf %110, %111 : vector<1x16x128xf32>
    %113 = arith.negf %112 : vector<1x16x128xf32>
    %114 = math.exp %113 : vector<1x16x128xf32>
    %cst_33 = arith.constant 1.000000e+00 : f32
    %115 = vector.broadcast %cst_33 : f32 to vector<1x16x128xf32>
    %116 = arith.addf %115, %114 : vector<1x16x128xf32>
    %117 = arith.divf %115, %116 : vector<1x16x128xf32>
    %118 = tpu.iota {dimensions = array<i32: 1>} : vector<1x16x128xi32>
    %119 = vector.extract_strided_slice %117 {offsets = [0, 0, 0], sizes = [1, 1, 128], strides = [1, 1, 1]} : vector<1x16x128xf32> to vector<1x1x128xf32>
    %120 = vector.extract_strided_slice %117 {offsets = [0, 15, 0], sizes = [1, 1, 128], strides = [1, 1, 1]} : vector<1x16x128xf32> to vector<1x1x128xf32>
    %c2_i32_34 = arith.constant 2 : i32
    %121 = tpu.dynamic_rotate %117 by %c2_i32_34 dim 1 : vector<1x16x128xf32>, i32 -> vector<1x16x128xf32>
    %c2_i32_35 = arith.constant 2 : i32
    %122 = vector.broadcast %c2_i32_35 : i32 to vector<1x16x128xi32>
    %123 = arith.cmpi slt, %118, %122 : vector<1x16x128xi32>
    %124 = vector.shape_cast %119 : vector<1x1x128xf32> to vector<1x1x128xf32>
    %125 = vector.broadcast %124 : vector<1x1x128xf32> to vector<1x16x128xf32>
    %126 = arith.select %123, %125, %121 : vector<1x16x128xi1>, vector<1x16x128xf32>
    %127 = arith.addf %117, %126 : vector<1x16x128xf32>
    %c1_i32_36 = arith.constant 1 : i32
    %128 = tpu.dynamic_rotate %117 by %c1_i32_36 dim 1 : vector<1x16x128xf32>, i32 -> vector<1x16x128xf32>
    %c1_i32_37 = arith.constant 1 : i32
    %129 = vector.broadcast %c1_i32_37 : i32 to vector<1x16x128xi32>
    %130 = arith.cmpi slt, %118, %129 : vector<1x16x128xi32>
    %131 = vector.shape_cast %119 : vector<1x1x128xf32> to vector<1x1x128xf32>
    %132 = vector.broadcast %131 : vector<1x1x128xf32> to vector<1x16x128xf32>
    %133 = arith.select %130, %132, %128 : vector<1x16x128xi1>, vector<1x16x128xf32>
    %134 = arith.addf %127, %133 : vector<1x16x128xf32>
    %c15_i32_38 = arith.constant 15 : i32
    %135 = tpu.dynamic_rotate %117 by %c15_i32_38 dim 1 : vector<1x16x128xf32>, i32 -> vector<1x16x128xf32>
    %c15_i32_39 = arith.constant 15 : i32
    %136 = vector.broadcast %c15_i32_39 : i32 to vector<1x16x128xi32>
    %137 = arith.cmpi sge, %118, %136 : vector<1x16x128xi32>
    %138 = vector.shape_cast %120 : vector<1x1x128xf32> to vector<1x1x128xf32>
    %139 = vector.broadcast %138 : vector<1x1x128xf32> to vector<1x16x128xf32>
    %140 = arith.select %137, %139, %135 : vector<1x16x128xi1>, vector<1x16x128xf32>
    %141 = arith.addf %134, %140 : vector<1x16x128xf32>
    %c14_i32_40 = arith.constant 14 : i32
    %142 = tpu.dynamic_rotate %117 by %c14_i32_40 dim 1 : vector<1x16x128xf32>, i32 -> vector<1x16x128xf32>
    %c14_i32_41 = arith.constant 14 : i32
    %143 = vector.broadcast %c14_i32_41 : i32 to vector<1x16x128xi32>
    %144 = arith.cmpi sge, %118, %143 : vector<1x16x128xi32>
    %145 = vector.shape_cast %120 : vector<1x1x128xf32> to vector<1x1x128xf32>
    %146 = vector.broadcast %145 : vector<1x1x128xf32> to vector<1x16x128xf32>
    %147 = arith.select %144, %146, %142 : vector<1x16x128xi1>, vector<1x16x128xf32>
    %148 = arith.addf %141, %147 : vector<1x16x128xf32>
    %cst_42 = arith.constant 2.000000e-01 : f32
    %149 = vector.broadcast %cst_42 : f32 to vector<1x16x128xf32>
    %150 = arith.mulf %148, %149 : vector<1x16x128xf32>
    %cst_43 = arith.constant 8.000000e-01 : f32
    %151 = vector.broadcast %cst_43 : f32 to vector<1x16x128xf32>
    %152 = arith.mulf %150, %151 : vector<1x16x128xf32>
    %cst_44 = arith.constant 1.000000e+00 : f32
    %153 = vector.broadcast %cst_44 : f32 to vector<1x16x128xf32>
    %154 = arith.subf %153, %152 : vector<1x16x128xf32>
    %155 = arith.mulf %0, %154 : vector<1x16x128xf32>
    %156 = arith.mulf %50, %152 : vector<1x16x128xf32>
    %157 = arith.addf %155, %156 : vector<1x16x128xf32>
    %c0_45 = arith.constant 0 : index
    %c0_46 = arith.constant 0 : index
    %c0_47 = arith.constant 0 : index
    %158 = vector.load %arg2[%c0_45, %c0_46, %c0_47] : memref<1x16x128xf32, #tpu.memory_space<vmem>>, vector<1x16x128xf32>
    tpu.vector_store %arg2[%c0_45, %c0_46, %c0_47], %157 {strides = array<i32>} : memref<1x16x128xf32, #tpu.memory_space<vmem>>, vector<1x16x128xf32>,
    return
  }
  func.func @transform_0(%arg0: i32) -> (i32, i32, i32) {
    %c0_i32 = arith.constant 0 : i32
    %c0_i32_0 = arith.constant 0 : i32
    %c0_i32_1 = arith.constant 0 : i32
    return %arg0, %c0_i32, %c0_i32_0 : i32, i32, i32
  }
  func.func @transform_1(%arg0: i32) -> (i32, i32, i32) {
    %c0_i32 = arith.constant 0 : i32
    %c0_i32_0 = arith.constant 0 : i32
    %c0_i32_1 = arith.constant 0 : i32
    return %arg0, %c0_i32, %c0_i32_0 : i32, i32, i32
  }
}

</mosaic_0001>

<bundles_post_ra>
// kernel: direct_horizontal_line_filter.1
= control target key start
LH: loop header
LB: loop body
LE: loop exit
PB: predicated region body
PF: predicated region fallthrough
CT: control target
= control target key end

     0   :  { %s301_s8 = smov 15   ;;  %s302_s9 = smov 127   ;;  %v10_v4 = vlaneseq  ;;  %s444_s0 = inlined_call_operand.vmem [shape: f32[1,16,128], index: 0, kind: input, shape index: {}]   ;;  %s445_s1 = inlined_call_operand.vmem [shape: f32[1,16,128], index: 1, kind: output, shape index: {}]  }
   0x1   :  { %v322_v0 = vld [vmem:[%s444_s0] sm:$0xff]  ;;  %v329_v1 = vld [vmem:[%s444_s0 + $0x8] sm:$0xff]  ;;  %s303_s0 = smov 126   ;;  %s304_s12 = smov 14  }
   0x2   :  { %83 = vrot.lane.b32.xlu1 %v322_v0, %s301_s8  ;;  %79 = vrot.lane.b32.xlu0 %v322_v0, %s302_s9  ;;  %v132_v2 = vmul.f32 %v329_v1, %v329_v1  ;;  %v131_v3 = vmul.f32 %v322_v0, %v322_v0  ;;  %v11_v5 = vand.u32 127, %v10_v4  ;;  %s305_s13 = smov 124   ;;  %s306_s14 = smov 12  }
   0x3   :  { %s307_s15 = smov 120   ;;  %s308_s16 = smov 8  }
   0x4   :  { %v338_v6 = vand.u32 15, %v11_v5 }
   0x6   :  { %85 = vrot.lane.b32.xlu1 %v329_v1, %s301_s8  ;;  %81 = vrot.lane.b32.xlu0 %v329_v1, %s302_s9  ;;  %vm87_vm0 = vcmp.lt.s32.totalorder %v338_v6, 15  ;;  %vm100_vm1 = vcmp.lt.s32.totalorder %v338_v6, 14  ;;  %vm113_vm2 = vcmp.lt.s32.totalorder %v338_v6, 12  ;;  %vm126_vm3 = vcmp.lt.s32.totalorder %v338_v6, 8 }
   0xa   :  { %135 = vrot.lane.b32.xlu1 %v132_v2, %s302_s9  ;;  %133 = vrot.lane.b32.xlu0 %v131_v3, %s302_s9 }
   0xe   :  { %139 = vrot.lane.b32.xlu1 %v132_v2, %s301_s8  ;;  %137 = vrot.lane.b32.xlu0 %v131_v3, %s301_s8 }
  0x74   :  { %v84_v7 = vpop.permute.xlu1 %83  ;;  %v80_v8 = vpop.permute.xlu0 %79 }
  0x75   :  { %v88_v9 = vsel %vm87_vm0, %v80_v8, %v84_v7 }
  0x76   :  { %v90_v10 = vadd.f32 %v88_v9, %v322_v0 }
  0x78   :  { %v86_v11 = vpop.permute.xlu1 %85  ;;  %v82_v12 = vpop.permute.xlu0 %81  ;;  %92 = vrot.lane.b32.xlu0 %v90_v10, %s303_s0 }
  0x79   :  { %v89_v13 = vsel %vm87_vm0, %v82_v12, %v86_v11 }
  0x7a   :  { %v91_v14 = vadd.f32 %v89_v13, %v329_v1 }
  0x7c   :  { %v136_v15 = vpop.permute.xlu1 %135  ;;  %94 = vrot.lane.b32.xlu1 %v91_v14, %s303_s0  ;;  %96 = vrot.lane.b32.xlu0 %v90_v10, %s304_s12  ;;  %v134_v16 = vpop.permute.xlu0 %133 }
  0x80   :  { %v140_v17 = vpop.permute.xlu1 %139  ;;  %98 = vrot.lane.b32.xlu1 %v91_v14, %s304_s12  ;;  %v138_v18 = vpop.permute.xlu0 %137 }
  0x81   :  { %v142_v19 = vsel %vm87_vm0, %v136_v15, %v140_v17  ;;  %v141_v20 = vsel %vm87_vm0, %v134_v16, %v138_v18 }
  0x82   :  { %v144_v21 = vadd.f32 %v142_v19, %v132_v2  ;;  %v143_v22 = vadd.f32 %v141_v20, %v131_v3 }
  0x84   :  { %147 = vrot.lane.b32.xlu1 %v144_v21, %s303_s0  ;;  %145 = vrot.lane.b32.xlu0 %v143_v22, %s303_s0 }
  0x88   :  { %151 = vrot.lane.b32.xlu1 %v144_v21, %s304_s12  ;;  %149 = vrot.lane.b32.xlu0 %v143_v22, %s304_s12 }
  0xea   :  { %v93_v23 = vpop.permute.xlu0 %92 }
  0xee   :  { %v95_v24 = vpop.permute.xlu1 %94  ;;  %v97_v25 = vpop.permute.xlu0 %96 }
  0xef   :  { %v101_v26 = vsel %vm100_vm1, %v93_v23, %v97_v25 }
  0xf0   :  { %v103_v27 = vadd.f32 %v101_v26, %v90_v10 }
  0xf2   :  { %v99_v28 = vpop.permute.xlu1 %98  ;;  %105 = vrot.lane.b32.xlu0 %v103_v27, %s305_s13 }
  0xf3   :  { %v102_v29 = vsel %vm100_vm1, %v95_v24, %v99_v28 }
  0xf4   :  { %v104_v30 = vadd.f32 %v102_v29, %v91_v14 }
  0xf6   :  { %107 = vrot.lane.b32.xlu1 %v104_v30, %s305_s13  ;;  %v148_v31 = vpop.permute.xlu1 %147  ;;  %109 = vrot.lane.b32.xlu0 %v103_v27, %s306_s14  ;;  %v146_v32 = vpop.permute.xlu0 %145 }
  0xfa   :  { %111 = vrot.lane.b32.xlu1 %v104_v30, %s306_s14  ;;  %v152_v33 = vpop.permute.xlu1 %151  ;;  %v150_v34 = vpop.permute.xlu0 %149 }
  0xfb   :  { %v154_v35 = vsel %vm100_vm1, %v148_v31, %v152_v33  ;;  %v153_v36 = vsel %vm100_vm1, %v146_v32, %v150_v34 }
  0xfc   :  { %v156_v37 = vadd.f32 %v154_v35, %v144_v21  ;;  %v155_v38 = vadd.f32 %v153_v36, %v143_v22  ;;  %v371_v36 = vshrl.u32 %v10_v4, 7 }
  0xfe   :  { %159 = vrot.lane.b32.xlu1 %v156_v37, %s305_s13  ;;  %157 = vrot.lane.b32.xlu0 %v155_v38, %s305_s13  ;;  %vm29_vm8 = vcmp.lt.s32.totalorder %v371_v36, 2  ;;  %vm43_vm9 = vcmp.lt.s32.totalorder %v371_v36, 1  ;;  %vm53_vm10 = vcmp.lt.s32.totalorder %v371_v36, 7  ;;  %vm68_vm12 = vcmp.lt.s32.totalorder %v371_v36, 6 }
 0x102   :  { %163 = vrot.lane.b32.xlu1 %v156_v37, %s306_s14  ;;  %161 = vrot.lane.b32.xlu0 %v155_v38, %s306_s14 }
 0x164   :  { %v106_v39 = vpop.permute.xlu0 %105 }
 0x168   :  { %v108_v40 = vpop.permute.xlu1 %107  ;;  %v110_v41 = vpop.permute.xlu0 %109 }
 0x169   :  { %v114_v42 = vsel %vm113_vm2, %v106_v39, %v110_v41  ;;  %v27_v39 = vrot.slane %v322_v0, 6  ;;  %v35_v41 = vsub.s32 0, %v371_v36 }
 0x16a   :  { %v116_v43 = vadd.f32 %v114_v42, %v103_v27 }
 0x16c   :  { %v112_v44 = vpop.permute.xlu1 %111  ;;  %118 = vrot.lane.b32.xlu0 %v116_v43, %s307_s15 }
 0x16d   :  { %v115_v45 = vsel %vm113_vm2, %v108_v40, %v112_v44  ;;  %v36_v44 = vrot.slane %v322_v0, %v35_v41 }
 0x16e   :  { %v117_v46 = vadd.f32 %v115_v45, %v104_v30  ;;  %v42_v45 = vrot.slane %v329_v1, 7 }
 0x170   :  { %120 = vrot.lane.b32.xlu1 %v117_v46, %s307_s15  ;;  %v160_v47 = vpop.permute.xlu1 %159  ;;  %122 = vrot.lane.b32.xlu0 %v116_v43, %s308_s16  ;;  %v158_v48 = vpop.permute.xlu0 %157 }
 0x174   :  { %124 = vrot.lane.b32.xlu1 %v117_v46, %s308_s16  ;;  %v164_v49 = vpop.permute.xlu1 %163  ;;  %v162_v50 = vpop.permute.xlu0 %161 }
 0x175   :  { %v166_v51 = vsel %vm113_vm2, %v160_v47, %v164_v49  ;;  %v165_v52 = vsel %vm113_vm2, %v158_v48, %v162_v50  ;;  %v26_v50 = vadd.s32 8, %v371_v36 }
 0x176   :  { %v168_v53 = vadd.f32 %v166_v51, %v156_v37  ;;  %v167_v54 = vadd.f32 %v165_v52, %v155_v38  ;;  %v28_v38 = vrot.slane %v329_v1, 6  ;;  %v52_v51 = vrot.slane %v329_v1, 1 }
 0x177   :  { %v51_v52 = vrot.slane %v322_v0, 1  ;;  %vm57_vm11 = vcmp.ge.s32.totalorder %v26_v50, 15  ;;  %vm72_vm13 = vcmp.ge.s32.totalorder %v26_v50, 14 }
 0x178   :  { %171 = vrot.lane.b32.xlu1 %v168_v53, %s307_s15  ;;  %169 = vrot.lane.b32.xlu0 %v167_v54, %s307_s15  ;;  %v31_v4 = vsel %vm29_vm8, %v28_v38, %v27_v39  ;;  %v30_v47 = vsel %vm29_vm8, %v27_v39, %v28_v38 }
 0x179   :  { %v37_v48 = vsel %vm29_vm8, %v36_v44, %v31_v4 }
 0x17c   :  { %175 = vrot.lane.b32.xlu1 %v168_v53, %s308_s16  ;;  %173 = vrot.lane.b32.xlu0 %v167_v54, %s308_s16 }
 0x1de   :  { %v119_v55 = vpop.permute.xlu0 %118 }
 0x1e2   :  { %v121_v56 = vpop.permute.xlu1 %120  ;;  %v123_v57 = vpop.permute.xlu0 %122 }
 0x1e3   :  { %v127_v58 = vsel %vm126_vm3, %v119_v55, %v123_v57  ;;  %v40_v55 = vadd.f32 %v30_v47, %v329_v1 }
 0x1e4   :  { %v129_v61 = vadd.f32 %v127_v58, %v116_v43 }
 0x1e6   :  { %v125_v59 = vpop.permute.xlu1 %124  ;;  %v181_v3 = vmul.f32 %v129_v61, %v129_v61  ;;  %v55_v61 = vsel %vm53_vm10, %v52_v51, %v51_v52 }
 0x1e7   :  { %v128_v60 = vsel %vm126_vm3, %v121_v56, %v125_v59  ;;  %v67_v59 = vrot.slane %v329_v1, 2 }
 0x1e8   :  { %v130_v62 = vadd.f32 %v128_v60, %v117_v46  ;;  %v183_v11 = vmul.f32 0.0625, %v181_v3  ;;  %v41_v46 = vrot.slane %v322_v0, 7 }
 0x1ea   :  { %v172_v63 = vpop.permute.xlu1 %171  ;;  %v170_v2 = vpop.permute.xlu0 %169  ;;  %v182_v5 = vmul.f32 %v130_v62, %v130_v62  ;;  %v45_v49 = vsel %vm43_vm9, %v42_v45, %v41_v46  ;;  %v44_v56 = vsel %vm43_vm9, %v41_v46, %v42_v45  ;;  %v66_v62 = vrot.slane %v322_v0, 2 }
 0x1eb   :  { %v47_v57 = vsel %vm43_vm9, %v36_v44, %v45_v49  ;;  %v50_v3 = vadd.f32 %v44_v56, %v40_v55 }
 0x1ec   :  { %v184_v12 = vmul.f32 0.0625, %v182_v5 }
 0x1ee   :  { %v176_v7 = vpop.permute.xlu1 %175  ;;  %v174_v8 = vpop.permute.xlu0 %173 }
 0x1ef   :  { %v178_v9 = vsel %vm126_vm3, %v172_v63, %v176_v7  ;;  %v177_v10 = vsel %vm126_vm3, %v170_v2, %v174_v8 }
 0x1f0   :  { %v180_v13 = vadd.f32 %v178_v9, %v168_v53  ;;  %v179_v14 = vadd.f32 %v177_v10, %v167_v54  ;;  %v60_v53 = vsub.s32 7, %v371_v36  ;;  %v39_v54 = vadd.f32 %v37_v48, %v322_v0 }
 0x1f2   :  { %v186_v15 = vsub.f32 %v180_v13, %v184_v12  ;;  %v185_v6 = vsub.f32 %v179_v14, %v183_v11  ;;  %v61_v58 = vrot.slane %v329_v1, %v60_v53  ;;  %v49_v2 = vadd.f32 %v47_v57, %v39_v54 }
 0x1f4   :  { %v188_v16 = vmul.f32 0.06666667, %v186_v15  ;;  %v187_v17 = vmul.f32 0.06666667, %v185_v6  ;;  %v63_v12 = vsel %vm57_vm11, %v61_v58, %v55_v61 }
 0x1f6   :  { %v190_v18 = vmax.f32 %v188_v16, 0.0  ;;  %v189_v19 = vmax.f32 %v187_v17, 0.0 }
 0x1f8   :  { %289 = vrsqrt.f32 %v190_v18  ;;  %vm200_vm4 = vcmp.eq.f32.partialorder %v190_v18, inf  ;;  %v203_v23 = vand.u32 2147483648, %v190_v18  ;;  %vm202_vm5 = vcmp.eq.f32.partialorder %v190_v18, 0.0 }
 0x1f9   :  { %291 = vrsqrt.f32 %v189_v19  ;;  %vm193_vm6 = vcmp.eq.f32.partialorder %v189_v19, inf  ;;  %v196_v26 = vand.u32 2147483648, %v189_v19  ;;  %vm195_vm7 = vcmp.eq.f32.partialorder %v189_v19, 0.0 }
 0x202   :  { %v290_v20 = vpop.eup %289 }
 0x203   :  { %v292_v21 = vpop.eup %291  ;;  %v199_v22 = vmul.f32 %v290_v20, %v190_v18  ;;  %v70_v20 = vsel %vm68_vm12, %v67_v59, %v66_v62 }
 0x204   :  { %v192_v24 = vmul.f32 %v292_v21, %v189_v19 }
 0x205   :  { %v201_v25 = vsel %vm200_vm4, %v190_v18, %v199_v22 }
 0x206   :  { %v204_v27 = vsel %vm202_vm5, %v203_v23, %v201_v25  ;;  %v194_v28 = vsel %vm193_vm6, %v189_v19, %v192_v24  ;;  %v54_v19 = vsel %vm53_vm10, %v51_v52, %v52_v51 }
 0x207   :  { %v206_v29 = vsub.f32 0.05, %v204_v27  ;;  %v197_v30 = vsel %vm195_vm7, %v196_v26, %v194_v28  ;;  %v65_v26 = vadd.f32 %v63_v12, %v50_v3 }
 0x208   :  { %v205_v31 = vsub.f32 0.05, %v197_v30  ;;  %v64_v30 = vadd.f32 %v54_v19, %v49_v2 }
 0x209   :  { %v280_v32 = vmul.f32 -10.0, %v206_v29 }
 0x20a   :  { %v279_v33 = vmul.f32 -10.0, %v205_v31  ;;  %v74_v31 = vsel %vm72_vm13, %v61_v58, %v70_v20 }
 0x20b   :  { %v213_v34 = vmul.f32 1.442695, %v280_v32 }
 0x20c   :  { %v211_v35 = vmul.f32 1.442695, %v279_v33 }
 0x20d   :  { %293 = vpow2.f32 %v213_v34  ;;  %v69_v34 = vsel %vm68_vm12, %v66_v62, %v67_v59 }
 0x20e   :  { %295 = vpow2.f32 %v211_v35 }
 0x217   :  { %v294_v37 = vpop.eup %293 }
 0x218   :  { %v296_v40 = vpop.eup %295  ;;  %v216_v42 = vadd.f32 1.0, %v294_v37 }
 0x219   :  { %v215_v43 = vadd.f32 1.0, %v296_v40  ;;  %v76_v40 = vadd.f32 %v74_v31, %v65_v26 }
 0x21a   :  { %297 = vrcp.f32 %v216_v42 }
 0x21b   :  { %299 = vrcp.f32 %v215_v43  ;;  %v75_v43 = vadd.f32 %v69_v34, %v64_v30  ;;  %v78_v46 = vmul.f32 0.2, %v76_v40 }
 0x21d   :  { %v77_v48 = vmul.f32 0.2, %v75_v43 }
 0x224   :  { %v298_v60 = vpop.eup %297 }
 0x225   :  { %v300_v63 = vpop.eup %299  ;;  %v222_v5 = vrot.slane %v298_v60, 6  ;;  %v234_v7 = vrot.slane %v298_v60, 7  ;;  %v242_v8 = vrot.slane %v298_v60, 1  ;;  %v254_v13 = vrot.slane %v298_v60, 2 }
 0x226   :  { %v221_v9 = vrot.slane %v300_v63, 6  ;;  %v228_v10 = vrot.slane %v300_v63, %v35_v41  ;;  %v233_v11 = vrot.slane %v300_v63, 7  ;;  %v241_v14 = vrot.slane %v300_v63, 1 }
 0x227   :  { %v253_v15 = vrot.slane %v300_v63, 2  ;;  %v248_v6 = vrot.slane %v298_v60, %v60_v53 }
 0x228   :  { %v223_v16 = vsel %vm29_vm8, %v221_v9, %v222_v5  ;;  %v224_v17 = vsel %vm29_vm8, %v222_v5, %v221_v9  ;;  %v236_v18 = vsel %vm43_vm9, %v234_v7, %v233_v11  ;;  %v235_v24 = vsel %vm43_vm9, %v233_v11, %v234_v7 }
 0x229   :  { %v229_v21 = vsel %vm29_vm8, %v228_v10, %v224_v17  ;;  %v232_v22 = vadd.f32 %v298_v60, %v223_v16  ;;  %v244_v25 = vsel %vm53_vm10, %v242_v8, %v241_v14  ;;  %v237_v27 = vsel %vm43_vm9, %v228_v10, %v236_v18 }
 0x22a   :  { %v231_v23 = vadd.f32 %v300_v63, %v229_v21  ;;  %v256_v29 = vsel %vm68_vm12, %v254_v13, %v253_v15  ;;  %v250_v33 = vsel %vm57_vm11, %v248_v6, %v244_v25  ;;  %v243_v35 = vsel %vm53_vm10, %v241_v14, %v242_v8 }
 0x22b   :  { %v240_v28 = vadd.f32 %v235_v24, %v232_v22  ;;  %v258_v39 = vsel %vm72_vm13, %v248_v6, %v256_v29  ;;  %v255_v41 = vsel %vm68_vm12, %v253_v15, %v254_v13 }
 0x22c   :  { %v239_v32 = vadd.f32 %v237_v27, %v231_v23 }
 0x22d   :  { %v252_v37 = vadd.f32 %v250_v33, %v240_v28 }
 0x22e   :  { %v251_v38 = vadd.f32 %v243_v35, %v239_v32 }
 0x22f   :  { %v260_v42 = vadd.f32 %v258_v39, %v252_v37 }
 0x230   :  { %v259_v44 = vadd.f32 %v255_v41, %v251_v38 }
 0x231   :  { %v262_v45 = vmul.f32 0.2, %v260_v42 }
 0x232   :  { %v261_v4 = vmul.f32 0.2, %v259_v44 }
 0x233   :  { %v264_v47 = vmul.f32 0.8, %v262_v45 }
 0x234   :  { %v263_v49 = vmul.f32 0.8, %v261_v4 }
 0x235   :  { %v266_v51 = vsub.f32 1.0, %v264_v47  ;;  %v270_v54 = vmul.f32 %v264_v47, %v78_v46 }
 0x236   :  { %v265_v52 = vsub.f32 1.0, %v263_v49  ;;  %v269_v55 = vmul.f32 %v263_v49, %v77_v48 }
 0x237   :  { %v268_v53 = vmul.f32 %v266_v51, %v329_v1 }
 0x238   :  { %v267_v50 = vmul.f32 %v265_v52, %v322_v0 }
 0x239   :  { %v272_v56 = vadd.f32 %v270_v54, %v268_v53 }
 0x23a   :  { %v271_v36 = vadd.f32 %v269_v55, %v267_v50 }
 0x23b   :  { %274 = vst [vmem:[%s445_s1 + $0x8] sm:$0xff] %v272_v56 }
 0x23c   :  { %273 = vst [vmem:[%s445_s1] sm:$0xff] %v271_v36 }

</bundles_post_ra>
